<compile_context>
chip_gen: v5e
topology: v5e:2x2
jax: 0.10.0
libtpu: 0.0.40
codegen_flags: <defaults>
</compile_context>

<pallas_src>
import math
from functools import partial

import jax
import jax.numpy as jnp
from jax.experimental import pallas as pl
from jax.experimental.pallas import tpu as pltpu


def _round_up(x, m):
    return -(-x // m) * m


def _pad_rows_to(x, n_pad):
    pad = n_pad - x.shape[0]
    if pad == 0:
        return x
    return jnp.pad(x, ((0, pad),) + ((0, 0),) * (x.ndim - 1))


# ----------------------------------------------------------------------------
# Kernel 1a: preference rows  ->  h = [pt | pv],  hw = [pt@W | pv@W] (bf16)
# Row-tiled; W resident (constant block index).
# ----------------------------------------------------------------------------
def _pref_kernel(pt_ref, pv_ref, w_ref, h_ref, hw_ref):
    pt = pt_ref[...]
    pv = pv_ref[...]
    h_ref[...] = jnp.concatenate([pt, pv], axis=1)
    w = w_ref[...]
    hw_ref[...] = jnp.concatenate(
        [jnp.dot(pt, w, preferred_element_type=jnp.float32),
         jnp.dot(pv, w, preferred_element_type=jnp.float32)],
        axis=1).astype(hw_ref.dtype)


def project_prefs(pt, pv, w, *, tb=128):
    n, d = pt.shape
    hd = w.shape[1]
    tb = min(tb, _round_up(n, 8))
    n_pad = _round_up(n, tb)
    ptp = _pad_rows_to(pt, n_pad)
    pvp = _pad_rows_to(pv, n_pad)
    h, hw = pl.pallas_call(
        _pref_kernel,
        out_shape=(jax.ShapeDtypeStruct((n_pad, 2 * d), jnp.float32),
                   jax.ShapeDtypeStruct((n_pad, 2 * hd), jnp.bfloat16)),
        grid=(n_pad // tb,),
        in_specs=[pl.BlockSpec((tb, d), lambda i: (i, 0)),
                  pl.BlockSpec((tb, d), lambda i: (i, 0)),
                  pl.BlockSpec(w.shape, lambda i: (0, 0))],
        out_specs=(pl.BlockSpec((tb, 2 * d), lambda i: (i, 0)),
                   pl.BlockSpec((tb, 2 * hd), lambda i: (i, 0))),
        compiler_params=pltpu.CompilerParams(
            dimension_semantics=("parallel",)),
    )(ptp, pvp, w)
    return h[:n], hw[:n]


# ----------------------------------------------------------------------------
# Kernel 1b: item rows  ->  h = [ti@W1 | ii@W2],  hw = [(ti@W1)@W | (ii@W2)@W]
# Row-tiled so the large raw img features stream HBM->VMEM tile by tile.
# ----------------------------------------------------------------------------
def _item_kernel(ti_ref, ii_ref, w1_ref, w2_ref, w_ref, h_ref, hw_ref):
    pt = jnp.dot(ti_ref[...], w1_ref[...], preferred_element_type=jnp.float32)
    pv = jnp.dot(ii_ref[...], w2_ref[...], preferred_element_type=jnp.float32)
    h_ref[...] = jnp.concatenate([pt, pv], axis=1)
    w = w_ref[...]
    hw_ref[...] = jnp.concatenate(
        [jnp.dot(pt, w, preferred_element_type=jnp.float32),
         jnp.dot(pv, w, preferred_element_type=jnp.float32)],
        axis=1).astype(hw_ref.dtype)


def project_items(ti, ii, w1, w2, w, *, tb=128):
    n = ti.shape[0]
    f_text, d = w1.shape
    f_img = w2.shape[0]
    hd = w.shape[1]
    tb = min(tb, _round_up(n, 8))
    n_pad = _round_up(n, tb)
    tip = _pad_rows_to(ti, n_pad)
    iip = _pad_rows_to(ii, n_pad)
    h, hw = pl.pallas_call(
        _item_kernel,
        out_shape=(jax.ShapeDtypeStruct((n_pad, 2 * d), jnp.float32),
                   jax.ShapeDtypeStruct((n_pad, 2 * hd), jnp.bfloat16)),
        grid=(n_pad // tb,),
        in_specs=[pl.BlockSpec((tb, f_text), lambda i: (i, 0)),
                  pl.BlockSpec((tb, f_img), lambda i: (i, 0)),
                  pl.BlockSpec(w1.shape, lambda i: (0, 0)),
                  pl.BlockSpec(w2.shape, lambda i: (0, 0)),
                  pl.BlockSpec(w.shape, lambda i: (0, 0))],
        out_specs=(pl.BlockSpec((tb, 2 * d), lambda i: (i, 0)),
                   pl.BlockSpec((tb, 2 * hd), lambda i: (i, 0))),
        compiler_params=pltpu.CompilerParams(
            dimension_semantics=("parallel",)),
    )(tip, iip, w1, w2, w)
    return h[:n], hw[:n]


# ----------------------------------------------------------------------------
# Kernel 2: fused graph layer (both branches at once) + fused BN statistics.
#   out   = relu(adj @ hw) + residual * h       (adj, hw bf16; f32 accumulate)
#   stats = per-row-tile column [sum ; sum_sq] of out  (emitted at k == last)
# Tiled over (row tiles, K tiles).  hw is VMEM-resident (fetched once),
# the output block is the accumulator (resident across k), adj is the only
# per-step HBM stream.
# ----------------------------------------------------------------------------
def _gcn_kernel(adj_ref, hw_ref, h_ref, o_ref, stats_ref, *, residual, tk):
    k = pl.program_id(1)

    @pl.when(k == 0)
    def _():
        o_ref[...] = jnp.zeros_like(o_ref)

    start = pl.multiple_of(k * tk, tk)
    hw_k = hw_ref[pl.ds(start, tk), :]
    o_ref[...] += jnp.dot(adj_ref[...], hw_k, preferred_element_type=jnp.float32)

    @pl.when(k == pl.num_programs(1) - 1)
    def _():
        out = jnp.maximum(o_ref[...], 0.0) + residual * h_ref[...]
        o_ref[...] = out
        s = jnp.sum(out, axis=0, keepdims=True)
        sq = jnp.sum(out * out, axis=0, keepdims=True)
        stats_ref[0] = jnp.concatenate([s, sq], axis=0)


def gcn_aggregate(adj_bf16, hw_bf16, h_f32, residual, *, tm=512, tk=1024):
    n, d2 = h_f32.shape
    assert hw_bf16.shape == (n, d2) and adj_bf16.shape == (n, n)
    assert n % tm == 0 and n % tk == 0, "pad rows to the tile multiple first"
    n_rt = n // tm
    grid = (n_rt, n // tk)
    # NOTE: at real scale (N ~ 12k) use tm=512-1024, tk=1024-2048 so the
    # ~0.35 us per-grid-step overhead stays well below the adj DMA time.
    # VMEM per step ~ 2*tm*tk*2B (adj, double-buffered) + n*d2*2B (hw, resident)
    # + tm*d2*(4+4)B (h + out) -- comfortably under 48 MiB for those sizes.
    return pl.pallas_call(
        partial(_gcn_kernel, residual=residual, tk=tk),
        out_shape=(jax.ShapeDtypeStruct((n, d2), jnp.float32),
                   jax.ShapeDtypeStruct((n_rt, 2, d2), jnp.float32)),
        grid=grid,
        in_specs=[
            pl.BlockSpec((tm, tk), lambda i, k: (i, k)),     # adj tile (bf16), streamed
            pl.BlockSpec((n, d2), lambda i, k: (0, 0)),      # hw slab (bf16), resident
            pl.BlockSpec((tm, d2), lambda i, k: (i, 0)),     # residual feats (f32)
        ],
        out_specs=(pl.BlockSpec((tm, d2), lambda i, k: (i, 0)),
                   pl.BlockSpec((1, 2, d2), lambda i, k: (i, 0, 0))),
        compiler_params=pltpu.CompilerParams(
            dimension_semantics=("parallel", "arbitrary"),
            vmem_limit_bytes=48 * 1024 * 1024),
    )(adj_bf16, hw_bf16, h_f32)


# ----------------------------------------------------------------------------
# Kernel 3: BatchNorm1d apply (stats already produced by the gcn finalize).
#   x * scale + shift   with scale = gamma * rsqrt(var + eps),
#                            shift = beta - mean * scale
# The tiny [n_row_tiles, 2, d2] partial-stat slab is kept resident and reduced
# in-kernel; mean/var use the *true* (unpadded) row count.
# ----------------------------------------------------------------------------
def _bn_apply_kernel(x_ref, stats_ref, g_ref, b_ref, o_ref, *, inv_n, eps):
    s = jnp.sum(stats_ref[...], axis=0)            # (2, d2): [col_sum; col_sumsq]
    mean = s[0:1, :] * inv_n
    var = s[1:2, :] * inv_n - mean * mean          # biased variance (BN training)
    scale = g_ref[...] * jax.lax.rsqrt(var + eps)
    shift = b_ref[...] - mean * scale
    o_ref[...] = x_ref[...] * scale + shift


def batchnorm_apply(x, stats, gamma, beta, *, true_n, tm=512, eps=1e-5):
    n, d2 = x.shape
    tm = min(tm, n)
    assert n % tm == 0
    n_rt = stats.shape[0]
    row_spec = pl.BlockSpec((tm, d2), lambda i: (i, 0))
    vec_spec = pl.BlockSpec((1, d2), lambda i: (0, 0))
    stats_spec = pl.BlockSpec((n_rt, 2, d2), lambda i: (0, 0, 0))
    return pl.pallas_call(
        partial(_bn_apply_kernel, inv_n=1.0 / true_n, eps=eps),
        out_shape=jax.ShapeDtypeStruct((n, d2), jnp.float32),
        grid=(n // tm,),
        in_specs=[row_spec, stats_spec, vec_spec, vec_spec],
        out_specs=row_spec,
        compiler_params=pltpu.CompilerParams(dimension_semantics=("parallel",)),
    )(x, stats, gamma.reshape(1, d2), beta.reshape(1, d2))


# ----------------------------------------------------------------------------
# Full forward
# ----------------------------------------------------------------------------
def forward(params, adj_bf16, *, tm=512, tk=1024, tb=128, tm_bn=None, eps=1e-5):
    n = adj_bf16.shape[0]
    w = params["W_layer"]

    h_pref, hw_pref = project_prefs(
        params["preference_t"], params["preference_v"], w, tb=tb)
    h_item, hw_item = project_items(
        params["text_item"], params["img_item"],
        params["linear1"], params["linear2"], w, tb=tb)

    # [pref rows ; item rows], columns already [text | img] (cat(dim=1) order).
    h = jnp.concatenate([h_pref, h_item], axis=0)
    hw = jnp.concatenate([hw_pref, hw_item], axis=0)
    assert h.shape[0] == n

    # Zero-pad nodes to the aggregation-tile multiple.  Padded rows produce
    # exactly 0 in the aggregated output, so the fused BN sums stay unbiased.
    mult = tm * tk // math.gcd(tm, tk)
    n_pad = _round_up(n, mult)
    pad = n_pad - n
    if pad:
        adj_bf16 = jnp.pad(adj_bf16, ((0, pad), (0, pad)))
        h = jnp.pad(h, ((0, pad), (0, 0)))
        hw = jnp.pad(hw, ((0, pad), (0, 0)))

    agg, stats = gcn_aggregate(adj_bf16, hw, h, float(params["residual"]),
                               tm=tm, tk=tk)
    out = batchnorm_apply(agg, stats, params["bn_gamma"], params["bn_beta"],
                          true_n=n, tm=(tm_bn or tm), eps=eps)
    return out[:n]


# ----------------------------------------------------------------------------
# Pure-JAX reference (same bf16 quantisation of adj / hw as the kernels)
# ----------------------------------------------------------------------------
def reference(params, adj_bf16):
    proj_t = params["text_item"] @ params["linear1"]
    proj_v = params["img_item"] @ params["linear2"]
    text = jnp.concatenate([params["preference_t"], proj_t], axis=0)
    img = jnp.concatenate([params["preference_v"], proj_v], axis=0)
    h = jnp.concatenate([text, img], axis=1)
    w = params["W_layer"]
    hw = jnp.concatenate([text @ w, img @ w], axis=1)
    hw = hw.astype(jnp.bfloat16).astype(jnp.float32)
    adj = adj_bf16.astype(jnp.float32)
    agg = adj @ hw
    out = jnp.maximum(agg, 0.0) + params["residual"] * h
    mean = out.mean(axis=0, keepdims=True)
    var = ((out - mean) ** 2).mean(axis=0, keepdims=True)
    return ((out - mean) * jax.lax.rsqrt(var + 1e-5)
            * params["bn_gamma"][None, :] + params["bn_beta"][None, :])


if __name__ == "__main__":
    key = jax.random.PRNGKey(0)
    keys = jax.random.split(key, 8)

    # Small shapes consistent with the module (original: 6038 pref rows,
    # text feat 128, img feat 2048, in/h dim 64).  Node counts deliberately
    # NOT tile multiples so the zero-padding path is exercised.
    N_pref, N_item = 120, 120
    N = N_pref + N_item              # num_nodes = 240
    F_text, F_img = 128, 256         # raw text / image item feature dims
    in_dim = h_dim = out_dim = 64    # h_dim == out_dim so BN(out_dim*2) matches
    residual = 0.12

    def xavier(k, shape):
        std = (2.0 / (shape[0] + shape[1])) ** 0.5
        return (std * jax.random.normal(k, shape)).astype(jnp.float32)

    params = {
        "preference_t": xavier(keys[0], (N_pref, in_dim)),
        "preference_v": xavier(keys[1], (N_pref, in_dim)),
        "text_item": jax.random.normal(keys[2], (N_item, F_text), dtype=jnp.float32),
        "img_item": jax.random.normal(keys[3], (N_item, F_img), dtype=jnp.float32),
        "linear1": xavier(keys[4], (F_text, in_dim)),
        "linear2": xavier(keys[5], (F_img, in_dim)),
        "W_layer": xavier(keys[6], (in_dim, h_dim)),
        # BatchNorm1d affine params (PyTorch default init: gamma=1, beta=0)
        "bn_gamma": jnp.ones((2 * out_dim,), dtype=jnp.float32),
        "bn_beta": jnp.zeros((2 * out_dim,), dtype=jnp.float32),
        "residual": residual,
    }

    # Synthetic graph + 'both' (symmetric) normalisation: D^-1/2 (A+I) D^-1/2.
    a = (jax.random.uniform(keys[7], (N, N)) < 0.2).astype(jnp.float32)
    a = jnp.maximum(a, a.T) + jnp.eye(N, dtype=jnp.float32)
    dinv = 1.0 / jnp.sqrt(a.sum(axis=1))
    adj_norm = a * dinv[:, None] * dinv[None, :]
    # Cast once, outside the forward pass (adj is the dominant HBM stream).
    adj_bf16 = adj_norm.astype(jnp.bfloat16)

    # Small tiles here so the K-accumulation path (grid = (2, 2)) and the
    # row-padding path (240 -> 256) are exercised; at real scale use
    # tm=512-1024, tk=1024-2048.
    out = forward(params, adj_bf16, tm=128, tk=128, tb=64, tm_bn=128)
    out = jax.block_until_ready(out)

    assert out.shape == (N, 2 * out_dim)
    assert jnp.all(jnp.isfinite(out))

    ref = jax.block_until_ready(reference(params, adj_bf16))
    assert jnp.allclose(out, ref, atol=5e-2, rtol=5e-2), (
        float(jnp.max(jnp.abs(out - ref))))

    print("KERNEL_OK")
</pallas_src>

<mosaic_0001>
module attributes {stable_mosaic.version = 11 : i64} {
  func.func @_pref_kernel(%arg0: i32, %arg1: memref<64x64xf32, #tpu.memory_space<vmem>>, %arg2: memref<64x64xf32, #tpu.memory_space<vmem>>, %arg3: memref<64x64xf32, #tpu.memory_space<vmem>>, %arg4: memref<64x128xf32, #tpu.memory_space<vmem>>, %arg5: memref<64x128xbf16, #tpu.memory_space<vmem>>) attributes {dimension_semantics = [#tpu.dimension_semantics<parallel>], iteration_bounds = array<i64: 2>, scalar_prefetch = 0 : i64, scratch_operands = 0 : i64, tpu.core_type = #tpu.core_type<tc>, window_params = [{transform_indices = @transform_0, window_bounds = array<i64: 64, 64>}, {transform_indices = @transform_1, window_bounds = array<i64: 64, 64>}, {pipeline_mode = #tpu.pipeline_mode<synchronous>, transform_indices = @transform_2, window_bounds = array<i64: 64, 64>}, {transform_indices = @transform_3, window_bounds = array<i64: 64, 128>}, {transform_indices = @transform_4, window_bounds = array<i64: 64, 128>}]} {
    %c0 = arith.constant 0 : index
    %c0_0 = arith.constant 0 : index
    %0 = vector.load %arg1[%c0, %c0_0] : memref<64x64xf32, #tpu.memory_space<vmem>>, vector<64x64xf32>
    %c0_1 = arith.constant 0 : index
    %c0_2 = arith.constant 0 : index
    %1 = vector.load %arg2[%c0_1, %c0_2] : memref<64x64xf32, #tpu.memory_space<vmem>>, vector<64x64xf32>
    %2 = tpu.concatenate %0, %1 in 1 : vector<64x64xf32>, vector<64x64xf32> -> vector<64x128xf32>
    %c0_3 = arith.constant 0 : index
    %c0_4 = arith.constant 0 : index
    %3 = vector.load %arg4[%c0_3, %c0_4] : memref<64x128xf32, #tpu.memory_space<vmem>>, vector<64x128xf32>
    tpu.vector_store %arg4[%c0_3, %c0_4], %2 {strides = array<i32>} : memref<64x128xf32, #tpu.memory_space<vmem>>, vector<64x128xf32>,
    %c0_5 = arith.constant 0 : index
    %c0_6 = arith.constant 0 : index
    %4 = vector.load %arg3[%c0_5, %c0_6] : memref<64x64xf32, #tpu.memory_space<vmem>>, vector<64x64xf32>
    %cst = arith.constant dense<0.000000e+00> : vector<64x64xf32>
    %5 = tpu.matmul %0, %4, %cst {dimension_numbers = #tpu.dot_dimension_numbers<[1], [0], [0], [1], [0, 0, 1, 1], [], []>} : vector<64x64xf32>, vector<64x64xf32>, vector<64x64xf32> -> vector<64x64xf32>
    %cst_7 = arith.constant dense<0.000000e+00> : vector<64x64xf32>
    %6 = tpu.matmul %1, %4, %cst_7 {dimension_numbers = #tpu.dot_dimension_numbers<[1], [0], [0], [1], [0, 0, 1, 1], [], []>} : vector<64x64xf32>, vector<64x64xf32>, vector<64x64xf32> -> vector<64x64xf32>
    %7 = tpu.concatenate %5, %6 in 1 : vector<64x64xf32>, vector<64x64xf32> -> vector<64x128xf32>
    %8 = arith.truncf %7 : vector<64x128xf32> to vector<64x128xbf16>
    %c0_8 = arith.constant 0 : index
    %c0_9 = arith.constant 0 : index
    %9 = vector.load %arg5[%c0_8, %c0_9] : memref<64x128xbf16, #tpu.memory_space<vmem>>, vector<64x128xbf16>
    tpu.vector_store %arg5[%c0_8, %c0_9], %8 {strides = array<i32>} : memref<64x128xbf16, #tpu.memory_space<vmem>>, vector<64x128xbf16>,
    return
  }
  func.func @transform_0(%arg0: i32) -> (i32, i32) {
    %c0_i32 = arith.constant 0 : i32
    %c0_i32_0 = arith.constant 0 : i32
    return %arg0, %c0_i32 : i32, i32
  }
  func.func @transform_1(%arg0: i32) -> (i32, i32) {
    %c0_i32 = arith.constant 0 : i32
    %c0_i32_0 = arith.constant 0 : i32
    return %arg0, %c0_i32 : i32, i32
  }
  func.func @transform_2(%arg0: i32) -> (i32, i32) {
    %c0_i32 = arith.constant 0 : i32
    %c0_i32_0 = arith.constant 0 : i32
    %c0_i32_1 = arith.constant 0 : i32
    return %c0_i32, %c0_i32_0 : i32, i32
  }
  func.func @transform_3(%arg0: i32) -> (i32, i32) {
    %c0_i32 = arith.constant 0 : i32
    %c0_i32_0 = arith.constant 0 : i32
    return %arg0, %c0_i32 : i32, i32
  }
  func.func @transform_4(%arg0: i32) -> (i32, i32) {
    %c0_i32 = arith.constant 0 : i32
    %c0_i32_0 = arith.constant 0 : i32
    return %arg0, %c0_i32 : i32, i32
  }
}

</mosaic_0001>

<bundles_post_ra>
// kernel: tpu_custom_call.1
= control target key start
LH: loop header
LB: loop body
LE: loop exit
PB: predicated region body
PF: predicated region fallthrough
CT: control target
= control target key end

     0   :  { %10 = vsyncpa [#allocation3], 0  ;;  %s1135_s0 = inlined_call_operand.vmem [shape: f32[128,64], index: 0, kind: input, shape index: {}]   ;;  %s1136_s1 = inlined_call_operand.vmem [shape: f32[128,64], index: 1, kind: input, shape index: {}]   ;;  %s1137_s2 = inlined_call_operand.vmem [shape: f32[64,64], index: 2, kind: input, shape index: {}]   ;;  %s1138_s3 = inlined_call_operand.hbm [shape: f32[128,128], index: 3, kind: output, shape index: {0}]   ;;  %s1139_s4 = inlined_call_operand.hbm [shape: bf16[128,128], index: 4, kind: output, shape index: {1}]  }
   0x1   :  { %12 = vsyncpa [#allocation3 + $0x1], 0 }
   0x2   :  { %13 = vsyncpa [#allocation5], 0 }
   0x3   :  { %15 = vsyncpa [#allocation5 + $0x1], 0  ;;  %s897_s15 = smov 0   ;;  %s899_s16 = smov 0  }
   0x4   :  { %s901_s17 = smov 0   ;;  %s903_s18 = smov 0  }
   0x5 LB: > { %s918_s19 = sadd.s32 4294967295, %s866_s18   ;;  %s629_s20 = sadd.s32 4294967294, %s866_s18   ;;  %s866_s18 = sphi %s903_s18, %s1145_s18   ;;  %s862_s17 = sphi %s901_s17, %s1144_s17   ;;  %s858_s16 = sphi %s899_s16, %s1143_s16   ;;  %s854_s15 = sphi %s897_s15, %s1142_s15  }
   0x6   : > { %s922_s21 = sadd.s32 1, %s866_s18   ;;  %s101_s22 = sadd.s32 1, %s862_s17 }
   0x7   : > { %s98_s23 = ssub.s32 %s866_s18, %s922_s21  ;;  %p111_p0 = scmp.ne.s32.totalorder %s862_s17, %s858_s16 }
   0x8   : > { %p99_p1 = scmp.eq.s32.totalorder %s98_s23, 0  ;;  %p112_p2 = scmp.eq.s32.totalorder %s918_s19, 1 }
   0x9   : > { %p117_p3 = scmp.ne.s32.totalorder %s858_s16, %s854_s15  ;;  %p118_p4 = scmp.eq.s32.totalorder %s629_s20, 1 }
   0xa   : > { %s933_s24 = scalar_select %p99_p1, %s862_s17, %s101_s22  }
   0xb   : > { %p935_p5 = por %p112_p2, %p111_p0  ;;  %p939_p6 = por %p118_p4, %p117_p3 }
   0xc   : > { %p632_p7 = scmp.ge.s32.totalorder %s866_s18, 1  ;;  %p183_p8 = scmp.lt.s32.totalorder %s866_s18, 3 }
   0xe   : > { %p184_p9 = pnand %p632_p7, %p183_p8 }
   0xf   : > { %s635_s5 = sshll.u32 (!%p184_p9), %s918_s19, 3  ;;  %s868_s8 = smov (!%p184_p9), 64  }
  0x10   : > { %187 = sbr.rel (%p184_p9) target bundleno = 326 (0x146), region = 32  ;;  %p220_p10 = scmp.lt.s32.totalorder (!%p184_p9), %s635_s5, 15 }
  0x11   : > { %s1031_s9 = sand.u32 (!%p184_p9), 1, %s858_s16   ;;  %s664_s14 = sshll.u32 (!%p184_p9), %s918_s19, 5 }
  0x12   : > { %s633_s10 = sshll.u32 (!%p184_p9), %s1031_s9, 6  ;;  %s663_s20 = sshll.u32 (!%p184_p9), %s918_s19, 6 }
  0x13   : > { %s1036_s11 = scalar_lea.vmem (!%p184_p9), [#allocation2], %s633_s10  ;;  %s518_s27 = scalar_lea.hbm (!%p184_p9), %s1139_s4, %s664_s14 }
  0x14   : > { %s521_s6 = sshll.u32 (!%p184_p9), %s518_s27, 4  ;;  %s490_s10 = scalar_lea.sflag (!%p184_p9), [#allocation5], %s1031_s9  ;;  %s522_s6 = int_to_ptr.hbm [resolvable:$true] %s521_s6 }
  0x15   : > { %v305_v0 = vld [vmem:[%s1137_s2 + $0x38] sm:$0xff]  ;;  %v304_v1 = vld [vmem:[%s1137_s2 + $0x30] sm:$0xff]  ;;  %v303_v2 = vld [vmem:[%s1137_s2 + $0x28] sm:$0xff]  ;;  %s1147_s5 = smov (!%p220_p10, %s635_s5), 15  ;;  %vm281_vm0 = vcmask 523264   ;;  %s792_s23 = scalar_lea.hbm %s1139_s4, 64 }
  0x16   : > { %395 = vmatpush.msra.mxu1 %v305_v0  ;;  %696 = vmatpush.msra.mxu3 %v305_v0  ;;  %v302_v3 = vld [vmem:[%s1137_s2 + $0x20] sm:$0xff]  ;;  %v301_v4 = vld [vmem:[%s1137_s2 + $0x18] sm:$0xff]  ;;  %s636_s12 = sshll.u32 %s1147_s5, 3  ;;  %v300_v5 = vld [vmem:[%s1137_s2 + $0x10] sm:$0xff]  ;;  %s501_s5 = scalar_lea.hbm %s1138_s3, %s663_s20 }
  0x17   : > { %688 = vmatpush.msra.mxu2 %v305_v0  ;;  %338 = vmatpush.msra.mxu0 %v305_v0  ;;  %v299_v6 = vld [vmem:[%s1137_s2 + $0x8] sm:$0xff]  ;;  %s970_s28 = scalar_lea.vmem %s1136_s1, %s636_s12  ;;  %v298_v7 = vld [vmem:[%s1137_s2] sm:$0xff]  ;;  %s978_s7 = scalar_lea.vmem %s1135_s0, %s636_s12 }
  0x18   : > { %396 = vmatpush.msra.mxu1 %v304_v1  ;;  %697 = vmatpush.msra.mxu3 %v304_v1  ;;  %v241_v8 = vld [vmem:[%s970_s28] sm:$0xff]  ;;  %v244_v12 = vld [vmem:[%s970_s28 + $0x18] sm:$0xff]  ;;  %v242_v13 = vld [vmem:[%s970_s28 + $0x8] sm:$0xff]  ;;  %s634_s12 = sshll.u32 %s1031_s9, 5  ;;  %s504_s19 = sshll.u32 %s501_s5, 4  ;;  %s1086_s19 = int_to_ptr.hbm [resolvable:$true] %s504_s19 }
  0x19   : > { %689 = vmatpush.msra.mxu2 %v304_v1  ;;  %339 = vmatpush.msra.mxu0 %v304_v1  ;;  %v245_v9 = vld [vmem:[%s970_s28 + $0x20] sm:$0xff]  ;;  %v246_v14 = vld [vmem:[%s970_s28 + $0x28] sm:$0xff]  ;;  %v243_v16 = vld [vmem:[%s970_s28 + $0x10] sm:$0xff]  ;;  %s1056_s13 = scalar_lea.vmem [#allocation4], %s634_s12  ;;  %s786_s12 = sshra.s32 %s522_s6, 4  ;;  %s787_s12 = int_to_ptr.hbm [resolvable:$true] %s786_s12 }
  0x1a   : > { %397 = vmatpush.msra.mxu1 %v303_v2  ;;  %698 = vmatpush.msra.mxu3 %v303_v2  ;;  %v237_v10 = vld [vmem:[%s978_s7 + $0x20] sm:$0xff]  ;;  %v998_v15 = vld [vmem:[%s978_s7 + $0x28] sm:$0xff]  ;;  %v247_v17 = vld [vmem:[%s970_s28 + $0x30] sm:$0xff]  ;;  %s788_s14 = scalar_lea.hbm %s787_s12, 32  ;;  %p793_p0 = scmp.lt.s32.totalorder %s787_s12, %s1139_s4 }
  0x1b   : > { %690 = vmatpush.msra.mxu2 %v303_v2  ;;  %340 = vmatpush.msra.mxu0 %v303_v2  ;;  %v984_v11 = vld [vmem:[%s978_s7] sm:$0xff]  ;;  %v1008_v18 = vld [vmem:[%s978_s7 + $0x30] sm:$0xff]  ;;  %v248_v19 = vld [vmem:[%s970_s28 + $0x38] sm:$0xff]  ;;  %s519_s28 = sshll.u32 %s1056_s13, 4  ;;  %p789_p11 = scmp.ne.s32.totalorder %s787_s12, %s788_s14  ;;  %s520_s28 = int_to_ptr.vmem [resolvable:$true] %s519_s28 }
  0x1c   : > { %398 = vmatpush.msra.mxu1 %v302_v3  ;;  %699 = vmatpush.msra.mxu3 %v302_v3  ;;  %v234_v20 = vld [vmem:[%s978_s7 + $0x8] sm:$0xff]  ;;  %v1021_v21 = vld [vmem:[%s978_s7 + $0x38] sm:$0xff]  ;;  %v235_v22 = vld [vmem:[%s978_s7 + $0x10] sm:$0xff]  ;;  %p794_p1 = scmp.lt.s32.totalorder %s792_s23, %s788_s14 }
  0x1d   : > { %691 = vmatpush.msra.mxu2 %v302_v3  ;;  %341 = vmatpush.msra.mxu0 %v302_v3  ;;  %v236_v23 = vld [vmem:[%s978_s7 + $0x18] sm:$0xff]  ;;  %s502_s7 = sshll.u32 %s1036_s11, 4  ;;  %p790_p12 = pnand %p789_p11, %p935_p5  ;;  %s1084_s7 = int_to_ptr.vmem [resolvable:$true] %s502_s7 }
  0x1e   : > { %399 = vmatpush.msra.mxu1 %v301_v4  ;;  %700 = vmatpush.msra.mxu3 %v301_v4  ;;  %p795_p2 = por %p794_p1, %p793_p0 }
  0x1f   : > { %692 = vmatpush.msra.mxu2 %v301_v4  ;;  %342 = vmatpush.msra.mxu0 %v301_v4  ;;  %p791_p13 = pneg %p790_p12 }
  0x20   : > { %400 = vmatpush.msra.mxu1 %v300_v5  ;;  %701 = vmatpush.msra.mxu3 %v300_v5 }
  0x21   : > { %693 = vmatpush.msra.mxu2 %v300_v5  ;;  %343 = vmatpush.msra.mxu0 %v300_v5  ;;  %p796_p3 = pnand %p795_p2, %p791_p13 }
  0x22   : > { %401 = vmatpush.msra.mxu1 %v299_v6  ;;  %702 = vmatpush.msra.mxu3 %v299_v6 }
  0x23   : > { %694 = vmatpush.msra.mxu2 %v299_v6  ;;  %344 = vmatpush.msra.mxu0 %v299_v6 }
  0x24   : > { %402 = vmatpush.msra.mxu1 %v298_v7  ;;  %703 = vmatpush.msra.mxu3 %v298_v7 }
  0x25   : > { %647 = vmatmul.msk.f32.vlgmr.msra.gmra.mxu1 %vm281_vm0, %v241_v8  ;;  %651 = vmatmul.msk.f32.vlgmr.msra.gmra.mxu3 %vm281_vm0, %v245_v9 }
  0x26   : > { %695 = vmatpush.msra.mxu2 %v298_v7  ;;  %345 = vmatpush.msra.mxu0 %v298_v7 }
  0x27   : > { %643 = vmatmul.msk.f32.vlgmr.msra.gmra.mxu2 %vm281_vm0, %v237_v10  ;;  %639 = vmatmul.msk.f32.vlgmr.msra.gmra.mxu0 %vm281_vm0, %v984_v11 }
  0x28   : > { %263 = vrot.lane.b32.xlu1 %v244_v12, %s868_s8  ;;  %257 = vrot.lane.b32.xlu0 %v241_v8, %s868_s8 }
  0x29   : > { %265 = vrot.lane.b32.xlu2 %v245_v9, %s868_s8 }
  0x2d   : > { %648 = vmatmul.msk.f32.gmra.mxu1 %vm281_vm0, %v242_v13  ;;  %652 = vmatmul.msk.f32.gmra.mxu3 %vm281_vm0, %v246_v14 }
  0x2f   : > { %644 = vmatmul.msk.f32.gmra.mxu2 %vm281_vm0, %v998_v15  ;;  %640 = vmatmul.msk.f32.gmra.mxu0 %vm281_vm0, %v234_v20 }
  0x30   : > { %259 = vrot.lane.b32.xlu0 %v242_v13, %s868_s8 }
  0x35   : > { %649 = vmatmul.msk.f32.gmra.mxu1 %vm281_vm0, %v243_v16  ;;  %653 = vmatmul.msk.f32.gmra.mxu3 %vm281_vm0, %v247_v17 }
  0x37   : > { %645 = vmatmul.msk.f32.gmra.mxu2 %vm281_vm0, %v1008_v18  ;;  %641 = vmatmul.msk.f32.gmra.mxu0 %vm281_vm0, %v235_v22 }
  0x38   : > { %261 = vrot.lane.b32.xlu0 %v243_v16, %s868_s8 }
  0x3d   : > { %650 = vmatmul.msk.f32.gmra.mxu1 %vm281_vm0, %v244_v12  ;;  %654 = vmatmul.msk.f32.gmra.mxu3 %vm281_vm0, %v248_v19 }
  0x3f   : > { %646 = vmatmul.msk.f32.gmra.mxu2 %vm281_vm0, %v1021_v21  ;;  %642 = vmatmul.msk.f32.gmra.mxu0 %vm281_vm0, %v236_v23 }
  0x40   : > { %267 = vrot.lane.b32.xlu0 %v246_v14, %s868_s8 }
  0x83   : > { %v266_v28 = vpop.permute.xlu2 %265 }
  0x84   : > { %v286_v29 = vsel %vm281_vm0, %v237_v10, %v266_v28 }
  0x85   : > { %294 = vst [vmem:[%s1036_s11 + $0x20] sm:$0xff] %v286_v29 }
  0x9a   : > { %v264_v38 = vpop.permute.xlu1 %263  ;;  %v258_v40 = vpop.permute.xlu0 %257 }
  0x9b   : > { %v285_v39 = vsel %vm281_vm0, %v236_v23, %v264_v38  ;;  %v282_v41 = vsel %vm281_vm0, %v984_v11, %v258_v40 }
  0x9c   : > { %293 = vst [vmem:[%s1036_s11 + $0x18] sm:$0xff] %v285_v39 }
  0x9d   : > { %290 = vst [vmem:[%s1036_s11] sm:$0xff] %v282_v41 }
  0xa2   : > { %v404_v24 = vpop.f32.mrf.mxu1  ;;  %v260_v43 = vpop.permute.xlu0 %259 }
  0xa3   : > { %v283_v44 = vsel %vm281_vm0, %v234_v20, %v260_v43 }
  0xa4   : > { %291 = vst [vmem:[%s1036_s11 + $0x8] sm:$0xff] %v283_v44  ;;  %v347_v53 = vpop.f32.mrf.mxu0 }
  0xa8   : > { %v416_v25 = vpop.f32.mrf.mxu3 }
  0xaa   : > { %v407_v26 = vpop.f32.mrf.mxu1  ;;  %v359_v42 = vpop.f32.mrf.mxu2 }
  0xab   : > { %v752_v27 = vpack.i.bf16 %v407_v26, %v404_v24  ;;  %v262_v47 = vpop.permute.xlu0 %261 }
  0xac   : > { %v284_v50 = vsel %vm281_vm0, %v235_v22, %v262_v47  ;;  %v350_v58 = vpop.f32.mrf.mxu0 }
  0xad   : > { %753 = vrot.lane.b32.xlu1 %v752_v27, %s868_s8  ;;  %292 = vst [vmem:[%s1036_s11 + $0x10] sm:$0xff] %v284_v50 }
  0xb0   : > { %v419_v30 = vpop.f32.mrf.mxu3 }
  0xb1   : > { %v757_v31 = vpack.i.bf16 %v419_v30, %v416_v25 }
  0xb2   : > { %v410_v32 = vpop.f32.mrf.mxu1  ;;  %v362_v45 = vpop.f32.mrf.mxu2 }
  0xb3   : > { %758 = vrot.lane.b32.xlu2 %v757_v31, %s868_s8  ;;  %v268_v56 = vpop.permute.xlu0 %267 }
  0xb4   : > { %v287_v57 = vsel %vm281_vm0, %v998_v15, %v268_v56  ;;  %v353_v8 = vpop.f32.mrf.mxu0 }
  0xb5   : > { %295 = vst [vmem:[%s1036_s11 + $0x28] sm:$0xff] %v287_v57 }
  0xb8   : > { %v422_v33 = vpop.f32.mrf.mxu3 }
  0xba   : > { %v413_v34 = vpop.f32.mrf.mxu1  ;;  %v365_v55 = vpop.f32.mrf.mxu2 }
  0xbb   : > { %v762_v35 = vpack.i.bf16 %v413_v34, %v410_v32 }
  0xbc   : > { %v356_v12 = vpop.f32.mrf.mxu0 }
  0xbd   : > { %763 = vrot.lane.b32.xlu1 %v762_v35, %s868_s8 }
  0xc0   : > { %v425_v36 = vpop.f32.mrf.mxu3 }
  0xc1   : > { %v767_v37 = vpack.i.bf16 %v425_v36, %v422_v33 }
  0xc2   : > { %v368_v60 = vpop.f32.mrf.mxu2 }
  0xc3   : > { %768 = vrot.lane.b32.xlu2 %v767_v37, %s868_s8 }
  0xc5   : > { %269 = vrot.lane.b32.xlu1 %v247_v17, %s868_s8 }
  0xcb   : > { %271 = vrot.lane.b32.xlu2 %v248_v19, %s868_s8 }
 0x10d   : > { %v759_v46 = vpop.permute.xlu2 %758 }
 0x10e   : > { %v761_v48 = vunpack.i.h.bf16 %v759_v46  ;;  %v760_v49 = vunpack.i.l.bf16 %v759_v46 }
 0x110   : > { %v464_v51 = vsel %vm281_vm0, %v359_v42, %v760_v49  ;;  %v465_v52 = vsel %vm281_vm0, %v362_v45, %v761_v48 }
 0x111   : > { %v678_v54 = vpack.c.bf16 %v465_v52, %v464_v51 }
 0x113   : > { %686 = vst [vmem:[%s1056_s13 + $0x10] sm:$0xff] %v678_v54  }
 0x11d   : > { %v769_v59 = vpop.permute.xlu2 %768 }
 0x11e   : > { %v771_v61 = vunpack.i.h.bf16 %v769_v59  ;;  %v770_v62 = vunpack.i.l.bf16 %v769_v59 }
 0x11f   : > { %v754_v63 = vpop.permute.xlu1 %753 }
 0x120   : > { %v756_v0 = vunpack.i.h.bf16 %v754_v63  ;;  %v755_v1 = vunpack.i.l.bf16 %v754_v63  ;;  %v466_v2 = vsel %vm281_vm0, %v365_v55, %v770_v62  ;;  %v467_v3 = vsel %vm281_vm0, %v368_v60, %v771_v61 }
 0x121   : > { %v683_v4 = vpack.c.bf16 %v467_v3, %v466_v2 }
 0x122   : > { %v460_v5 = vsel %vm281_vm0, %v347_v53, %v755_v1  ;;  %v461_v6 = vsel %vm281_vm0, %v350_v58, %v756_v0 }
 0x123   : > { %v668_v7 = vpack.c.bf16 %v461_v6, %v460_v5  ;;  %687 = vst [vmem:[%s1056_s13 + $0x18] sm:$0xff] %v683_v4  }
 0x125   : > { %669 = vst [vmem:[%s1056_s13] sm:$0xff] %v668_v7   ;;  %v272_v9 = vpop.permute.xlu2 %271 }
 0x126   : > { %v289_v10 = vsel %vm281_vm0, %v1021_v21, %v272_v9 }
 0x127   : > { %297 = vst [vmem:[%s1036_s11 + $0x38] sm:$0xff] %v289_v10 }
 0x12f   : > { %v764_v11 = vpop.permute.xlu1 %763 }
 0x130   : > { %v766_v13 = vunpack.i.h.bf16 %v764_v11  ;;  %v765_v14 = vunpack.i.l.bf16 %v764_v11 }
 0x132   : > { %v462_v15 = vsel %vm281_vm0, %v353_v8, %v765_v14  ;;  %v463_v16 = vsel %vm281_vm0, %v356_v12, %v766_v13 }
 0x133   : > { %v673_v17 = vpack.c.bf16 %v463_v16, %v462_v15 }
 0x135   : > { %685 = vst [vmem:[%s1056_s13 + $0x8] sm:$0xff] %v673_v17  }
 0x136   : > { %799 = shalt.err (!%p796_p3)
}
 0x137   : > { %s869_s13 = smov 4   ;;  %v270_v19 = vpop.permute.xlu1 %269  ;;  %s485_s30 = scalar_lea.sflag [#allocation3], %s1031_s9 }
 0x138   : > { %705 = dma.vmem_to_hbm [thread:$0]  (%p935_p5), %s520_s28, 512, %s522_s6, %s490_s10, %s868_s8, %s868_s8, %s869_s13   ;;  %v288_v20 = vsel %vm281_vm0, %v1008_v18, %v270_v19 }
 0x139   : > { %296 = vst [vmem:[%s1036_s11 + $0x30] sm:$0xff] %v288_v20  ;;  %s814_s5 = sshra.s32 %s1086_s19, 4  ;;  %s820_s22 = scalar_lea.hbm %s1138_s3, 128  ;;  %s815_s5 = int_to_ptr.hbm [resolvable:$true] %s814_s5 }
 0x13a   : > { %s816_s12 = scalar_lea.hbm %s815_s5, 64  ;;  %p821_p9 = scmp.lt.s32.totalorder %s815_s5, %s1138_s3 }
 0x13b   : > { %p817_p4 = scmp.ne.s32.totalorder %s815_s5, %s816_s12  ;;  %p822_p10 = scmp.lt.s32.totalorder %s820_s22, %s816_s12 }
 0x13d   : > { %p818_p7 = pnand %p817_p4, %p935_p5  ;;  %p823_p11 = por %p822_p10, %p821_p9 }
 0x13f   : > { %p819_p8 = pneg %p818_p7 }
 0x141   : > { %p824_p12 = pnand %p823_p11, %p819_p8 }
 0x143   : > { %827 = shalt.err (!%p824_p12)
}
 0x144   : > { %s870_s8 = smov 128   ;;  %s871_s9 = smov 8  }
 0x145   : > { %704 = dma.vmem_to_hbm [thread:$0]  (%p935_p5), %s1084_s7, 1024, %s1086_s19, %s485_s30, %s870_s8, %s870_s8, %s871_s9  }
 0x146 PF: > { %p715_p13 = scmp.ge.s32.totalorder %s866_s18, 2  ;;  %s536_s11 = sand.u32 1, %s854_s15  }
 0x147   : > { %s537_s28 = scalar_lea.sflag [#allocation3], %s536_s11 }
 0x148   : > { %p709_p0 = pnand %p715_p13, %p939_p6 }
 0x14a   : > { %p710_p1 = pneg %p709_p0 }
 0x14c   : > { %845 = dma.done.wait (%p710_p1), %s537_s28, 1024  }
 0x14d   : > { %847 = vsyncadd (%p710_p1), %s537_s28, 4294966272  ;;  %s547_s6 = scalar_lea.sflag [#allocation5], %s536_s11 }
 0x14e   : > { %849 = dma.done.wait (%p710_p1), %s547_s6, 512  }
 0x14f   : > { %851 = vsyncadd (%p710_p1), %s547_s6, 4294966784  ;;  %p18_p5 = scmp.ge.s32.totalorder %s922_s21, 4   ;;  %s1142_s15 = smov %s858_s16 }
 0x150   : > { %s1143_s16 = smov %s862_s17  ;;  %s1144_s17 = smov %s933_s24 }
 0x151   : > { %s1145_s18 = smov %s922_s21  ;;  %20 = sbr.rel (!%p18_p5) target bundleno = 5 (0x5), region = 87 }
 0x156   :  { %553 = vsyncpa [#allocation3], 1 }
 0x157   :  { %555 = vsyncpa [#allocation3 + $0x1], 1 }
 0x158   :  { %556 = vsyncpa [#allocation5], 1 }
 0x159   :  { %558 = vsyncpa [#allocation5 + $0x1], 1 }

</bundles_post_ra>
